<compile_context>
chip_gen: v5e
topology: v5e:2x2
jax: 0.10.0
libtpu: 0.0.40
codegen_flags: <defaults>
</compile_context>

<pallas_src>
import math

import jax
import jax.numpy as jnp
from jax.experimental import pallas as pl
from jax.experimental.pallas import tpu as pltpu


def _round_up(x, m):
    return ((x + m - 1) // m) * m


def _ffn_kernel(x_ref, w1_ref, b1_ref, w2_ref, b2_ref, o_ref):
    # Layer 1: x @ W1 (MXU, native input dtype, f32 accumulation), bias + ReLU in f32.
    h = jnp.dot(x_ref[...], w1_ref[...], preferred_element_type=jnp.float32)
    h = jnp.maximum(h + b1_ref[...], 0.0)          # (1, Hp) bias broadcasts over rows
    # Layer 2: cast h to the MXU operand dtype (bf16 when weights are bf16),
    # keep accumulation in f32.
    h = h.astype(w2_ref.dtype)
    o = jnp.dot(h, w2_ref[...], preferred_element_type=jnp.float32)
    o = o + b2_ref[...]                            # (1, Op) bias broadcasts over rows
    o_ref[...] = o.astype(o_ref.dtype)


def feed_forward_nn(x, w1, b1, w2, b2, *, tile_b_max=512):
    """x: (B, input_dim); w1: (input_dim, hidden); b1: (hidden,);
       w2: (hidden, output_dim); b2: (output_dim,). Returns (B, output_dim).

    MXU operand dtype follows the weight dtype (pass bf16 weights for the fast
    path); accumulation and the bias/ReLU epilogue are always f32. Output dtype
    matches x.dtype."""
    B, input_dim = x.shape
    hidden_dim = w1.shape[1]
    output_dim = w2.shape[1]

    cdt = w1.dtype  # compute dtype for MXU operands (f32 or bf16)

    # --- Lane-dense padding: hidden/output up to multiples of 128 (zero pads). ---
    Hp = _round_up(hidden_dim, 128)
    Op = _round_up(output_dim, 128)
    w1p = jnp.zeros((input_dim, Hp), cdt).at[:, :hidden_dim].set(w1.astype(cdt))
    w2p = jnp.zeros((Hp, Op), cdt).at[:hidden_dim, :output_dim].set(w2.astype(cdt))
    b1p = jnp.zeros((1, Hp), jnp.float32).at[0, :hidden_dim].set(b1.astype(jnp.float32))
    b2p = jnp.zeros((1, Op), jnp.float32).at[0, :output_dim].set(b2.astype(jnp.float32))

    # --- Batch tiling: largest tile (<= tile_b_max) that is a multiple of 8. ---
    tile_b = min(tile_b_max, _round_up(B, 8))
    B_pad = _round_up(B, tile_b)
    x_in = x.astype(cdt)
    if B_pad != B:
        x_in = jnp.zeros((B_pad, input_dim), cdt).at[:B].set(x_in)
    grid = (B_pad // tile_b,)

    # --- VMEM budget: resident weights/biases + double-buffered x/out + h. ---
    cbytes = jnp.dtype(cdt).itemsize
    obytes = jnp.dtype(x.dtype).itemsize
    est = (w1p.size * cbytes + w2p.size * cbytes
           + (b1p.size + b2p.size) * 4
           + 2 * tile_b * input_dim * cbytes      # x double buffer
           + 2 * tile_b * Op * obytes             # out double buffer
           + tile_b * Hp * 4)                     # f32 intermediate h
    vmem_limit = int(min(max(2 * est + (4 << 20), 32 << 20), 64 << 20))

    out = pl.pallas_call(
        _ffn_kernel,
        out_shape=jax.ShapeDtypeStruct((B_pad, Op), x.dtype),
        grid=grid,
        in_specs=[
            pl.BlockSpec((tile_b, input_dim), lambda i: (i, 0)),  # x: streamed
            pl.BlockSpec((input_dim, Hp), lambda i: (0, 0)),      # w1: resident
            pl.BlockSpec((1, Hp), lambda i: (0, 0)),              # b1: resident
            pl.BlockSpec((Hp, Op), lambda i: (0, 0)),             # w2: resident
            pl.BlockSpec((1, Op), lambda i: (0, 0)),              # b2: resident
        ],
        out_specs=pl.BlockSpec((tile_b, Op), lambda i: (i, 0)),
        compiler_params=pltpu.CompilerParams(
            dimension_semantics=("parallel",),
            vmem_limit_bytes=vmem_limit,
        ),
    )(x_in, w1p, b1p, w2p, b2p)

    return out[:B, :output_dim]


def init_params(key, input_dim, hidden_dim, output_dim):
    """Deterministic init mimicking nn.Linear's U(-1/sqrt(fan_in), 1/sqrt(fan_in)).
       Weights stored already transposed to (in, out) for the kernel."""
    k1, k2, k3, k4 = jax.random.split(key, 4)
    bound1 = 1.0 / math.sqrt(input_dim)
    bound2 = 1.0 / math.sqrt(hidden_dim)
    w1 = jax.random.uniform(k1, (input_dim, hidden_dim), jnp.float32, -bound1, bound1)
    b1 = jax.random.uniform(k2, (hidden_dim,), jnp.float32, -bound1, bound1)
    w2 = jax.random.uniform(k3, (hidden_dim, output_dim), jnp.float32, -bound2, bound2)
    b2 = jax.random.uniform(k4, (output_dim,), jnp.float32, -bound2, bound2)
    return w1, b1, w2, b2


if __name__ == "__main__":
    # Small shapes consistent with the module: batch=8, input=16, hidden=32, output=8.
    batch, input_dim, hidden_dim, output_dim = 8, 16, 32, 8

    key = jax.random.PRNGKey(0)
    kx, kp = jax.random.split(key)
    x = jax.random.normal(kx, (batch, input_dim), jnp.float32)
    w1, b1, w2, b2 = init_params(kp, input_dim, hidden_dim, output_dim)

    # Pure-JAX reference (same semantics as the PyTorch forward).
    ref = jnp.maximum(x @ w1 + b1, 0.0) @ w2 + b2

    # 1) f32 path, single grid step.
    out = jax.block_until_ready(feed_forward_nn(x, w1, b1, w2, b2))
    assert out.shape == (batch, output_dim)
    assert jnp.allclose(out, ref, atol=1e-5, rtol=1e-5)

    # 2) bf16-MXU path (weights shipped in bf16, f32 accumulation).
    out_bf16 = jax.block_until_ready(
        feed_forward_nn(x, w1.astype(jnp.bfloat16), b1,
                        w2.astype(jnp.bfloat16), b2))
    assert out_bf16.shape == (batch, output_dim)
    assert jnp.allclose(out_bf16.astype(jnp.float32), ref, atol=1e-1, rtol=1e-1)

    # 3) Larger, non-tile-aligned batch to exercise the batch grid + padding path.
    big_batch = 1000
    xb = jax.random.normal(jax.random.PRNGKey(1), (big_batch, input_dim), jnp.float32)
    out_big = jax.block_until_ready(feed_forward_nn(xb, w1, b1, w2, b2))
    ref_big = jnp.maximum(xb @ w1 + b1, 0.0) @ w2 + b2
    assert out_big.shape == (big_batch, output_dim)
    assert jnp.allclose(out_big, ref_big, atol=1e-4, rtol=1e-4)

    print("KERNEL_OK")
</pallas_src>

<mosaic_0001>
module attributes {stable_mosaic.version = 11 : i64} {
  func.func @_ffn_kernel(%arg0: i32, %arg1: memref<8x16xf32, #tpu.memory_space<vmem>>, %arg2: memref<16x128xf32, #tpu.memory_space<vmem>>, %arg3: memref<1x128xf32, #tpu.memory_space<vmem>>, %arg4: memref<128x128xf32, #tpu.memory_space<vmem>>, %arg5: memref<1x128xf32, #tpu.memory_space<vmem>>, %arg6: memref<8x128xf32, #tpu.memory_space<vmem>>) attributes {dimension_semantics = [#tpu.dimension_semantics<parallel>], iteration_bounds = array<i64: 1>, scalar_prefetch = 0 : i64, scratch_operands = 0 : i64, tpu.core_type = #tpu.core_type<tc>, window_params = [{transform_indices = @transform_0, window_bounds = array<i64: 8, 16>}, {pipeline_mode = #tpu.pipeline_mode<synchronous>, transform_indices = @transform_1, window_bounds = array<i64: 16, 128>}, {pipeline_mode = #tpu.pipeline_mode<synchronous>, transform_indices = @transform_2, window_bounds = array<i64: 1, 128>}, {pipeline_mode = #tpu.pipeline_mode<synchronous>, transform_indices = @transform_3, window_bounds = array<i64: 128, 128>}, {pipeline_mode = #tpu.pipeline_mode<synchronous>, transform_indices = @transform_4, window_bounds = array<i64: 1, 128>}, {transform_indices = @transform_5, window_bounds = array<i64: 8, 128>}]} {
    %c0 = arith.constant 0 : index
    %c0_0 = arith.constant 0 : index
    %0 = vector.load %arg1[%c0, %c0_0] : memref<8x16xf32, #tpu.memory_space<vmem>>, vector<8x16xf32>
    %c0_1 = arith.constant 0 : index
    %c0_2 = arith.constant 0 : index
    %1 = vector.load %arg2[%c0_1, %c0_2] : memref<16x128xf32, #tpu.memory_space<vmem>>, vector<16x128xf32>
    %cst = arith.constant dense<0.000000e+00> : vector<8x128xf32>
    %2 = tpu.matmul %0, %1, %cst {dimension_numbers = #tpu.dot_dimension_numbers<[1], [0], [0], [1], [0, 0, 1, 1], [], []>} : vector<8x16xf32>, vector<16x128xf32>, vector<8x128xf32> -> vector<8x128xf32>
    %c0_3 = arith.constant 0 : index
    %c0_4 = arith.constant 0 : index
    %3 = vector.load %arg3[%c0_3, %c0_4] : memref<1x128xf32, #tpu.memory_space<vmem>>, vector<1x128xf32>
    %4 = vector.broadcast %3 : vector<1x128xf32> to vector<8x128xf32>
    %5 = arith.addf %2, %4 : vector<8x128xf32>
    %cst_5 = arith.constant 0.000000e+00 : f32
    %6 = vector.broadcast %cst_5 : f32 to vector<8x128xf32>
    %7 = arith.maximumf %5, %6 : vector<8x128xf32>
    %c0_6 = arith.constant 0 : index
    %c0_7 = arith.constant 0 : index
    %8 = vector.load %arg4[%c0_6, %c0_7] : memref<128x128xf32, #tpu.memory_space<vmem>>, vector<128x128xf32>
    %cst_8 = arith.constant dense<0.000000e+00> : vector<8x128xf32>
    %9 = tpu.matmul %7, %8, %cst_8 {dimension_numbers = #tpu.dot_dimension_numbers<[1], [0], [0], [1], [0, 0, 1, 1], [], []>} : vector<8x128xf32>, vector<128x128xf32>, vector<8x128xf32> -> vector<8x128xf32>
    %c0_9 = arith.constant 0 : index
    %c0_10 = arith.constant 0 : index
    %10 = vector.load %arg5[%c0_9, %c0_10] : memref<1x128xf32, #tpu.memory_space<vmem>>, vector<1x128xf32>
    %11 = vector.broadcast %10 : vector<1x128xf32> to vector<8x128xf32>
    %12 = arith.addf %9, %11 : vector<8x128xf32>
    %c0_11 = arith.constant 0 : index
    %c0_12 = arith.constant 0 : index
    %13 = vector.load %arg6[%c0_11, %c0_12] : memref<8x128xf32, #tpu.memory_space<vmem>>, vector<8x128xf32>
    tpu.vector_store %arg6[%c0_11, %c0_12], %12 {strides = array<i32>} : memref<8x128xf32, #tpu.memory_space<vmem>>, vector<8x128xf32>,
    return
  }
  func.func @transform_0(%arg0: i32) -> (i32, i32) {
    %c0_i32 = arith.constant 0 : i32
    %c0_i32_0 = arith.constant 0 : i32
    return %arg0, %c0_i32 : i32, i32
  }
  func.func @transform_1(%arg0: i32) -> (i32, i32) {
    %c0_i32 = arith.constant 0 : i32
    %c0_i32_0 = arith.constant 0 : i32
    %c0_i32_1 = arith.constant 0 : i32
    return %c0_i32, %c0_i32_0 : i32, i32
  }
  func.func @transform_2(%arg0: i32) -> (i32, i32) {
    %c0_i32 = arith.constant 0 : i32
    %c0_i32_0 = arith.constant 0 : i32
    %c0_i32_1 = arith.constant 0 : i32
    return %c0_i32, %c0_i32_0 : i32, i32
  }
  func.func @transform_3(%arg0: i32) -> (i32, i32) {
    %c0_i32 = arith.constant 0 : i32
    %c0_i32_0 = arith.constant 0 : i32
    %c0_i32_1 = arith.constant 0 : i32
    return %c0_i32, %c0_i32_0 : i32, i32
  }
  func.func @transform_4(%arg0: i32) -> (i32, i32) {
    %c0_i32 = arith.constant 0 : i32
    %c0_i32_0 = arith.constant 0 : i32
    %c0_i32_1 = arith.constant 0 : i32
    return %c0_i32, %c0_i32_0 : i32, i32
  }
  func.func @transform_5(%arg0: i32) -> (i32, i32) {
    %c0_i32 = arith.constant 0 : i32
    %c0_i32_0 = arith.constant 0 : i32
    return %arg0, %c0_i32 : i32, i32
  }
}

</mosaic_0001>

<bundles_post_ra>
// kernel: tpu_custom_call.1
= control target key start
LH: loop header
LB: loop body
LE: loop exit
PB: predicated region body
PF: predicated region fallthrough
CT: control target
= control target key end

     0   :  { %10 = vsyncpa [#allocation3], 0  ;;  %s322_s0 = inlined_call_operand.hbm [shape: f32[8,16], index: 0, kind: input, shape index: {}]   ;;  %s323_s1 = inlined_call_operand.hbm [shape: f32[16,128], index: 1, kind: input, shape index: {}]   ;;  %s324_s2 = inlined_call_operand.vmem [shape: f32[1,128], index: 2, kind: input, shape index: {}]   ;;  %s325_s3 = inlined_call_operand.hbm [shape: f32[128,128], index: 3, kind: input, shape index: {}]   ;;  %s326_s4 = inlined_call_operand.vmem [shape: f32[1,128], index: 4, kind: input, shape index: {}]   ;;  %s327_s5 = inlined_call_operand.hbm [shape: f32[8,128], index: 5, kind: output, shape index: {}]  }
   0x1   :  { %11 = vsyncpa [#allocation6], 0  ;;  %s28_s20 = sshll.u32 %s323_s1, 4  ;;  %s29_s20 = int_to_ptr.hbm [resolvable:$true] %s28_s20 }
   0x2   :  { %12 = vsyncpa [#allocation4], 0  ;;  %s268_s21 = smov [#allocation5]   ;;  %s18_s25 = sshll.u32 %s322_s0, 4  ;;  %s19_s25 = int_to_ptr.hbm [resolvable:$true] %s18_s25 }
   0x3   :  { %s30_s22 = sshll.u32 %s268_s21, 4  ;;  %s269_s26 = smov 128   ;;  %s31_s22 = int_to_ptr.vmem [resolvable:$true] %s30_s22 }
   0x4   :  { %s270_s27 = smov 8   ;;  %s271_s28 = smov [#allocation2]  }
   0x5   :  { %36 = dma.hbm_to_vmem [thread:$0]  %s29_s20, 256, %s31_s22, [#allocation6], %s269_s26, %s269_s26, %s270_s27  }
   0x6   :  { %s20_s29 = sshll.u32 %s271_s28, 4  ;;  %s43_s7 = sshll.u32 %s325_s3, 4  ;;  %s21_s29 = int_to_ptr.vmem [resolvable:$true] %s20_s29  ;;  %s44_s7 = int_to_ptr.hbm [resolvable:$true] %s43_s7 }
   0x7   :  { %23 = dma.hbm_to_vmem [thread:$0]  %s19_s25, 128, %s21_s29, [#allocation3]  }
   0x8   :  { %s272_s1 = smov [#allocation7]  }
   0x9   :  { %s45_s8 = sshll.u32 %s272_s1, 4  ;;  %s46_s8 = int_to_ptr.vmem [resolvable:$true] %s45_s8 }
   0xa   :  { %51 = dma.hbm_to_vmem [thread:$0]  %s44_s7, 2048, %s46_s8, [#allocation6], %s269_s26, %s269_s26, %s270_s27  }
   0xb   :  { %262 = dma.done.wait [#allocation3], 128  }
   0xc   :  { %263 = vsyncadd [#allocation3], 4294967168 }
   0xd   :  { %264 = dma.done.wait [#allocation6], 2304  }
   0xe   :  { %265 = vsyncadd [#allocation6], 4294964992  ;;  %v68_v0 = vld [vmem:[#allocation5 + $0x8] sm:$0xff]  ;;  %v67_v1 = vld [vmem:[#allocation5] sm:$0xff]  ;;  %vm73_vm0 = vcmask 130048   ;;  %s273_s11 = smov [#allocation8]  }
   0xf   :  { %91 = vmatpush.msra.mxu0 %v68_v0  ;;  %v66_v2 = vld [vmem:[#allocation2] sm:$0xff]  ;;  %v113_v3 = vld [vmem:[#allocation7 + $0x78] sm:$0xff]  ;;  %v112_v4 = vld [vmem:[#allocation7 + $0x70] sm:$0xff]  ;;  %s144_s12 = sshll.u32 %s273_s11, 4  ;;  %s146_s15 = sshll.u32 %s327_s5, 4  ;;  %s145_s12 = int_to_ptr.vmem [resolvable:$true] %s144_s12  ;;  %s147_s15 = int_to_ptr.hbm [resolvable:$true] %s146_s15 }
  0x10   :  { %118 = vmatpush.msra.mxu1 %v113_v3  ;;  %v111_v5 = vld [vmem:[#allocation7 + $0x68] sm:$0xff]  ;;  %v110_v6 = vld [vmem:[#allocation7 + $0x60] sm:$0xff]  ;;  %v109_v7 = vld [vmem:[#allocation7 + $0x58] sm:$0xff] }
  0x11   :  { %92 = vmatpush.msra.mxu0 %v67_v1  ;;  %v108_v8 = vld [vmem:[#allocation7 + $0x50] sm:$0xff]  ;;  %v107_v9 = vld [vmem:[#allocation7 + $0x48] sm:$0xff]  ;;  %v106_v10 = vld [vmem:[#allocation7 + $0x40] sm:$0xff] }
  0x12   :  { %157 = vmatmul.msk.f32.vlgmr.msra.gmra.mxu0 %vm73_vm0, %v66_v2  ;;  %119 = vmatpush.msra.mxu1 %v112_v4  ;;  %v105_v11 = vld [vmem:[#allocation7 + $0x38] sm:$0xff]  ;;  %v104_v12 = vld [vmem:[#allocation7 + $0x30] sm:$0xff]  ;;  %v103_v13 = vld [vmem:[#allocation7 + $0x28] sm:$0xff] }
  0x13   :  { %v102_v14 = vld [vmem:[#allocation7 + $0x20] sm:$0xff]  ;;  %v101_v15 = vld [vmem:[#allocation7 + $0x18] sm:$0xff]  ;;  %v100_v16 = vld [vmem:[#allocation7 + $0x10] sm:$0xff] }
  0x14   :  { %120 = vmatpush.msra.mxu1 %v111_v5  ;;  %v99_v17 = vld [vmem:[#allocation7 + $0x8] sm:$0xff]  ;;  %v98_v18 = vld [vmem:[#allocation7] sm:$0xff] }
  0x15   :  { %v164_v19 = vld [vmem:[%s324_s2] ss:$0 sm:$0xff] }
  0x16   :  { %121 = vmatpush.msra.mxu1 %v110_v6  ;;  %v165_v23 = vld [vmem:[%s326_s4] ss:$0 sm:$0xff] }
  0x18   :  { %122 = vmatpush.msra.mxu1 %v109_v7 }
  0x1a   :  { %123 = vmatpush.msra.mxu1 %v108_v8 }
  0x1c   :  { %124 = vmatpush.msra.mxu1 %v107_v9 }
  0x1e   :  { %125 = vmatpush.msra.mxu1 %v106_v10 }
  0x20   :  { %126 = vmatpush.msra.mxu1 %v105_v11 }
  0x22   :  { %127 = vmatpush.msra.mxu1 %v104_v12 }
  0x24   :  { %128 = vmatpush.msra.mxu1 %v103_v13 }
  0x26   :  { %129 = vmatpush.msra.mxu1 %v102_v14 }
  0x28   :  { %130 = vmatpush.msra.mxu1 %v101_v15 }
  0x2a   :  { %131 = vmatpush.msra.mxu1 %v100_v16 }
  0x2c   :  { %132 = vmatpush.msra.mxu1 %v99_v17 }
  0x2e   :  { %133 = vmatpush.msra.mxu1 %v98_v18 }
  0x8f   :  { %v94_v20 = vpop.f32.mrf.mxu0 }
  0x90   :  { %v95_v21 = vadd.f32 %v164_v19, %v94_v20 }
  0x92   :  { %v97_v22 = vmax.f32 %v95_v21, 0.0 }
  0x94   :  { %134 = vmatmul.f32.vlgmr.msra.gmra.mxu1 %v97_v22 }
 0x111   :  { %v135_v24 = vpop.f32.mrf.mxu1 }
 0x112   :  { %v136_v25 = vadd.f32 %v165_v23, %v135_v24 }
 0x114   :  { %138 = vst [vmem:[#allocation8] sm:$0xff] %v136_v25 }
 0x115   :  { %149 = dma.vmem_to_hbm [thread:$0]  %s145_s12, 128, %s147_s15, [#allocation4]  }
 0x116   :  { %266 = dma.done.wait [#allocation4], 128  }
 0x117   :  { %267 = vsyncadd [#allocation4], 4294967168 }
 0x118   :  { %154 = vsyncpa [#allocation3], 1 }
 0x119   :  { %155 = vsyncpa [#allocation6], 1 }
 0x11a   :  { %156 = vsyncpa [#allocation4], 1 }

</bundles_post_ra>
